<compile_context>
chip_gen: v7x
topology: tpu7x:2x2x1
jax: 0.10.0
libtpu: 0.0.40
codegen_flags: <defaults>
</compile_context>

<pallas_src>
import jax
import jax.numpy as jnp
from jax import lax
from jax.experimental import pallas as pl
from jax.experimental.pallas import tpu as pltpu


def _linear_dqn_kernel(x_ref, w_ref, o_ref):
    """Single-shot GEMV-shaped matmul: (B, K) x (N, K)^T -> (B, N)."""
    o_ref[...] = lax.dot_general(
        x_ref[...],                      # (B, K), K on lanes
        w_ref[...],                      # (N, K), K on lanes
        dimension_numbers=(((1,), (1,)), ((), ())),  # contract K with K
        preferred_element_type=jnp.float32,
    ).astype(o_ref.dtype)


def linear_dqn_forward(x_nchw, weight):
    """Forward of Linear_DQN.

    x_nchw: (B, C, H, W) float32
    weight: (num_outputs, num_features) float32, num_features = C*H*W
    returns: (B, num_outputs) float32
    """
    B = x_nchw.shape[0]
    x_flat = x_nchw.reshape(B, -1)       # matches x.view(x.size(0), -1)
    K = x_flat.shape[1]
    N, Kw = weight.shape
    assert Kw == K, "num_features mismatch"

    return pl.pallas_call(
        _linear_dqn_kernel,
        out_shape=jax.ShapeDtypeStruct((B, N), x_flat.dtype),
        in_specs=[
            pl.BlockSpec(memory_space=pltpu.MemorySpace.VMEM),  # x_flat whole
            pl.BlockSpec(memory_space=pltpu.MemorySpace.VMEM),  # weight whole
        ],
        out_specs=pl.BlockSpec(memory_space=pltpu.MemorySpace.VMEM),
    )(x_flat, weight)


if __name__ == "__main__":
    # Small shapes consistent with the module: NCHW input flattened into the
    # Linear head. B=2, C=4, H=W=16 -> num_features = 1024, num_outputs = 8.
    B, C, H, W = 2, 4, 16, 16
    num_features = C * H * W
    num_outputs = 8

    key = jax.random.PRNGKey(0)
    kx, kw = jax.random.split(key)
    x = jax.random.normal(kx, (B, C, H, W), dtype=jnp.float32)

    # Module semantics: Linear_Zero_Init -> weight filled with 0.0, no bias.
    weight_zero = jnp.zeros((num_outputs, num_features), dtype=jnp.float32)
    y = linear_dqn_forward(x, weight_zero)
    y = jax.block_until_ready(y)
    y_ref = x.reshape(B, -1) @ weight_zero.T
    assert y.shape == (B, num_outputs)
    assert jnp.allclose(y, y_ref, atol=1e-5), "mismatch vs reference (zero W)"

    # Extra correctness check with a non-trivial weight so the matmul path is
    # actually exercised (zero weight would trivially pass).
    weight_rnd = 0.02 * jax.random.normal(
        kw, (num_outputs, num_features), dtype=jnp.float32
    )
    y2 = jax.block_until_ready(linear_dqn_forward(x, weight_rnd))
    y2_ref = x.reshape(B, -1) @ weight_rnd.T
    assert jnp.allclose(y2, y2_ref, atol=1e-4), "mismatch vs reference (rnd W)"

    print("KERNEL_OK")
</pallas_src>

<mosaic_0001>
module attributes {stable_mosaic.version = 11 : i64} {
  func.func @_linear_dqn_kernel(%arg0: memref<2x1024xf32, #tpu.memory_space<vmem>>, %arg1: memref<8x1024xf32, #tpu.memory_space<vmem>>, %arg2: memref<2x8xf32, #tpu.memory_space<vmem>>) attributes {dimension_semantics = [], scalar_prefetch = 0 : i64, scratch_operands = 0 : i64, tpu.core_type = #tpu.core_type<tc>} {
    %c0 = arith.constant 0 : index
    %c0_0 = arith.constant 0 : index
    %0 = vector.load %arg0[%c0, %c0_0] : memref<2x1024xf32, #tpu.memory_space<vmem>>, vector<2x1024xf32>
    %c0_1 = arith.constant 0 : index
    %c0_2 = arith.constant 0 : index
    %1 = vector.load %arg1[%c0_1, %c0_2] : memref<8x1024xf32, #tpu.memory_space<vmem>>, vector<8x1024xf32>
    %cst = arith.constant dense<0.000000e+00> : vector<2x8xf32>
    %2 = tpu.matmul %0, %1, %cst {dimension_numbers = #tpu.dot_dimension_numbers<[1], [1], [0], [0], [0, 0, 1, 0], [], []>} : vector<2x1024xf32>, vector<8x1024xf32>, vector<2x8xf32> -> vector<2x8xf32>
    %c0_3 = arith.constant 0 : index
    %c0_4 = arith.constant 0 : index
    %3 = vector.load %arg2[%c0_3, %c0_4] : memref<2x8xf32, #tpu.memory_space<vmem>>, vector<2x8xf32>
    tpu.vector_store %arg2[%c0_3, %c0_4], %2 {strides = array<i32>} : memref<2x8xf32, #tpu.memory_space<vmem>>, vector<2x8xf32>,
    return
  }
}

</mosaic_0001>

<bundles_post_ra>
// kernel: tpu_custom_call.1
= control target key start
LH: loop header
LB: loop body
LE: loop exit
PB: predicated region body
PF: predicated region fallthrough
CT: control target
= control target key end

     0   :  { %7 = vsyncpa [#allocation3], 0  ;;  %s526_s0 = inlined_call_operand.hbm [shape: f32[2,1024], index: 0, kind: input, shape index: {}]   ;;  %s527_s1 = inlined_call_operand.hbm [shape: f32[8,1024], index: 1, kind: input, shape index: {}]   ;;  %s528_s2 = inlined_call_operand.hbm [shape: f32[2,8], index: 2, kind: output, shape index: {}]  }
   0x1   :  { %8 = vsyncpa [#allocation6], 0 }
   0x2   :  { %9 = vsyncpa [#allocation4], 0  ;;  %s471_s9 = smov [#allocation2]   ;;  %s472_s11 = smov [#allocation5]  }
   0x3   :  { %s16_s10 = sshll.u32 %s471_s9, 4  ;;  %s26_s12 = sshll.u32 %s472_s11, 4  ;;  %s17_s10 = int_to_ptr.vmem [resolvable:$true] %s16_s10  ;;  %s27_s12 = int_to_ptr.vmem [resolvable:$true] %s26_s12 }
   0x4   :  { %s399_s15 = scalar_lea.hbm %s526_s0, 256 }
   0x5   :  { %p400_p0 = scmp.ne.s32.totalorder %s526_s0, %s399_s15  ;;  %p403_p1 = scmp.lt.u32.totalorder %s399_s15, %s526_s0 }
   0x7   :  { %p405_p2 = pnand %p403_p1, %p400_p0 }
   0x9   :  { %408 = shalt.err (!%p405_p2)
}
   0xa   :  { %s409_s20 = scalar_lea.vmem %s17_s10, 256  ;;  %p414_p4 = scmp.lt.s32.totalorder %s17_s10, %s17_s10 }
   0xb   :  { %p410_p3 = scmp.ne.s32.totalorder %s17_s10, %s409_s20  ;;  %p415_p5 = scmp.lt.s32.totalorder %s409_s20, %s409_s20 }
   0xd   :  { %p416_p6 = por %p415_p5, %p414_p4 }
   0xf   :  { %p417_p7 = pnand %p416_p6, %p410_p3 }
  0x11   :  { %420 = shalt.err (!%p417_p7)
}
  0x12   :  { %19 = dma.hbm_to_vmem [thread:$0]  %s526_s0, 256, %s17_s10, [#allocation3]  }
  0x13   :  { %s421_s25 = scalar_lea.hbm %s527_s1, 1024 }
  0x14   :  { %p422_p8 = scmp.ne.s32.totalorder %s527_s1, %s421_s25  ;;  %p425_p9 = scmp.lt.u32.totalorder %s421_s25, %s527_s1 }
  0x16   :  { %p427_p10 = pnand %p425_p9, %p422_p8 }
  0x18   :  { %430 = shalt.err (!%p427_p10)
}
  0x19   :  { %s431_s30 = scalar_lea.vmem %s27_s12, 1024  ;;  %p436_p12 = scmp.lt.s32.totalorder %s27_s12, %s27_s12 }
  0x1a   :  { %p432_p11 = scmp.ne.s32.totalorder %s27_s12, %s431_s30  ;;  %p437_p13 = scmp.lt.s32.totalorder %s431_s30, %s431_s30 }
  0x1c   :  { %p438_p0 = por %p437_p13, %p436_p12 }
  0x1e   :  { %p439_p1 = pnand %p438_p0, %p432_p11 }
  0x20   :  { %442 = shalt.err (!%p439_p1)
}
  0x21   :  { %29 = dma.hbm_to_vmem [thread:$0]  %s527_s1, 1024, %s27_s12, [#allocation6]  }
  0x22   :  { %465 = dma.done.wait [#allocation3], 256  }
  0x23   :  { %466 = vsyncadd [#allocation3], 4294967040 }
  0x24   :  { %467 = dma.done.wait [#allocation6], 1024  }
  0x25   :  { %468 = vsyncadd [#allocation6], 4294966272  ;;  %v52_v0 = vlaneseq  ;;  %v473_v1 = vmov 1983009808   ;;  %v39_v6 = vld [vmem:[#allocation5 + $0x8] sm:$0xff]  ;;  %v38_v8 = vld [vmem:[#allocation5] sm:$0xff] }
  0x26   :  { %v50_v2 = vunpack.c.l.s4 %v473_v1  ;;  %v43_v7 = vld [vmem:[#allocation5 + $0x28] sm:$0xff]  ;;  %90 = vmatprep.subr.mxu1 %v39_v6  ;;  %v42_v9 = vld [vmem:[#allocation5 + $0x20] sm:$0xff]  ;;  %v36_v10 = vld [vmem:[#allocation2] sm:$0xff]  ;;  %s474_s1 = smov [#allocation7]   ;;  %vm370_vm0 = vcmask 58368  }
  0x27   :  { %v53_v3 = vshrl.u32 %v52_v0, 7  ;;  %230 = vmatprep.subr.mxu0 %v43_v7  ;;  %v41_v11 = vld [vmem:[#allocation5 + $0x18] sm:$0xff]  ;;  %91 = vmatpush1.xpose.msra.mxu1 %v38_v8  ;;  %v48_v12 = vcombine.high %v36_v10, %v36_v10  ;;  %v40_v21 = vld [vmem:[#allocation5 + $0x10] sm:$0xff]  ;;  %s378_s4 = sshll.u32 %s474_s1, 4  ;;  %s379_s4 = int_to_ptr.vmem [resolvable:$true] %s378_s4 }
  0x28   :  { %v51_v4 = vunpack.c.0.s8 %v50_v2  ;;  %231 = vmatpush1.xpose.msra.mxu0 %v42_v9  ;;  %v37_v14 = vld [vmem:[#allocation2 + $0x8] sm:$0xff]  ;;  %160 = vmatprep.subr.mxu1 %v41_v11  ;;  %v44_v23 = vld [vmem:[#allocation5 + $0x30] sm:$0xff]  ;;  %s443_s5 = scalar_lea.vmem %s379_s4, 32  ;;  %p448_p3 = scmp.lt.s32.totalorder %s379_s4, %s379_s4 }
  0x29   :  { %v45_v15 = vld [vmem:[#allocation5 + $0x38] sm:$0xff]  ;;  %v65_v16 = vcombine.high %v37_v14, %v37_v14  ;;  %p444_p2 = scmp.ne.s32.totalorder %s379_s4, %s443_s5  ;;  %p449_p4 = scmp.lt.s32.totalorder %s443_s5, %s443_s5 }
  0x2a   :  { %v54_v5 = vsub.s32 %v51_v4, %v53_v3  ;;  %300 = vmatprep.subr.mxu0 %v45_v15 }
  0x2b   :  { %p450_p5 = por %p449_p4, %p448_p3 }
  0x2c   :  { %v55_v13 = vrot.slane %v36_v10, %v54_v5  ;;  %v72_v17 = vrot.slane %v37_v14, %v54_v5  ;;  %v62_v19 = vrot.slane %v48_v12, %v54_v5  ;;  %v79_v22 = vrot.slane %v65_v16, %v54_v5 }
  0x2d   :  { %p451_p6 = pnand %p450_p5, %p444_p2 }
  0x2e   :  { %v63_v18 = vcombine.high %v55_v13, %v55_v13  ;;  %v80_v20 = vcombine.high %v72_v17, %v72_v17  ;;  %v64_v24 = vcombine.high %v62_v19, %v62_v19  ;;  %v81_v25 = vcombine.high %v79_v22, %v79_v22 }
  0x30   :  { %154 = vmatprep.mubr.f32.mxu1 %v63_v18  ;;  %294 = vmatprep.mubr.f32.mxu0 %v80_v20 }
  0x31   :  { %155 = vmatmul.mubr.f32.vlgmr.msra.gmra.mrb[0].mxu1 %v55_v13  ;;  %295 = vmatmul.mubr.f32.vlgmr.msra.gmra.mrb[0].mxu0 %v72_v17 }
  0x32   :  { %161 = vmatpush1.xpose.msra.mxu1 %v40_v21  ;;  %301 = vmatpush1.xpose.msra.mxu0 %v44_v23 }
  0x33   :  { %224 = vmatprep.mubr.f32.mxu1 %v64_v24  ;;  %364 = vmatprep.mubr.f32.mxu0 %v81_v25 }
  0x39   :  { %225 = vmatmul.mubr.f32.vlgmr.msra.gmra.mrb[0].mxu1 %v62_v19  ;;  %365 = vmatmul.mubr.f32.vlgmr.msra.gmra.mrb[0].mxu0 %v79_v22 }
 0x10c   :  { %v226_v26 = vpop.f32.mrb[0].mxu1  ;;  %v366_v27 = vpop.f32.mrb[0].mxu0 }
 0x10d   :  { %v228_v28 = vpop.f32.mrb[1].mxu1  ;;  %v388_v29 = vadd.f32 %v366_v27, %v226_v26  ;;  %v368_v30 = vpop.f32.mrb[1].mxu0 }
 0x10f   :  { %371 = vst.msk [vmem:[#allocation7] sm:$0x3] %vm370_vm0, %v388_v29 }
 0x110   :  { %454 = shalt.err (!%p451_p6)
}
 0x111   :  { %s455_s8 = scalar_lea.hbm %s528_s2, 32 }
 0x112   :  { %p456_p7 = scmp.ne.s32.totalorder %s528_s2, %s455_s8  ;;  %p459_p8 = scmp.lt.u32.totalorder %s455_s8, %s528_s2 }
 0x114   :  { %p461_p9 = pnand %p459_p8, %p456_p7 }
 0x116   :  { %464 = shalt.err (!%p461_p9)
}
 0x117   :  { %381 = dma.vmem_to_hbm [thread:$0]  %s379_s4, 32, %s528_s2, [#allocation4]  }
 0x118   :  { %469 = dma.done.wait [#allocation4], 32  }
 0x119   :  { %470 = vsyncadd [#allocation4], 4294967264 }
 0x11a   :  { %385 = vsyncpa [#allocation3], 1 }
 0x11b   :  { %386 = vsyncpa [#allocation6], 1 }
 0x11c   :  { %387 = vsyncpa [#allocation4], 1 }

</bundles_post_ra>
